<compile_context>
chip_gen: v7x
topology: tpu7x:2x2x1
jax: 0.10.0
libtpu: 0.0.40
codegen_flags: <defaults>
</compile_context>

<pallas_src>
import functools
from typing import NamedTuple

import jax
import jax.numpy as jnp
from jax import lax
from jax.experimental import pallas as pl
from jax.experimental.pallas import tpu as pltpu


# ----------------------------------------------------------------------------
# helpers
# ----------------------------------------------------------------------------
def get_qrange(signed: bool, n_bits: int):
    """Mirror of the PyTorch helper: signed / unsigned integer range."""
    if signed:
        return -(2 ** (n_bits - 1)), 2 ** (n_bits - 1) - 1
    return 0, 2 ** n_bits - 1


def _round_up(a: int, b: int) -> int:
    return (a + b - 1) // b * b


def _pick_tile(dim: int, want: int, quantum: int):
    """Largest tile <= want (multiple of quantum) dividing dim padded to quantum."""
    padded = _round_up(dim, quantum)
    t = min(_round_up(want, quantum), padded)
    while padded % t:
        t -= quantum
    return t, padded


def _check_bits(qcfg):
    for side in ("input", "weight"):
        nb = qcfg[side]["args"]["n_bits"]
        if nb > 8:
            # TODO(synk): >8-bit codes are not exact in bf16; would need an f32/int code path.
            raise NotImplementedError("bf16-code MXU path requires n_bits <= 8")


class PreparedWeight(NamedTuple):
    qwT: jax.Array       # [Kp, Np] bf16 weight codes, pre-transposed (lane-dense)
    ws_row: jax.Array    # [1, Np]  f32 per-out-channel scale
    colsum: jax.Array    # [1, Np]  f32 per-channel sum_k of codes (zero-point term)
    out_features: int
    in_features: int


# ----------------------------------------------------------------------------
# one-shot weight-quantization pre-pass kernel
# (run once at model-load / whenever weight or wt_scale changes)
# ----------------------------------------------------------------------------
def _wquant_kernel(wT_ref, inv_ws_ref, qwT_ref, colsum_ref, *, wt_min, wt_max):
    k = pl.program_id(1)
    # codes = clamp(round(w * (1/s_w)), wt_min, wt_max)   (per-out-channel scale)
    codes = jnp.clip(jnp.round(wT_ref[...] * inv_ws_ref[...]), wt_min, wt_max)
    qwT_ref[...] = codes.astype(jnp.bfloat16)

    # per-out-channel sum of codes over K (accumulated across the k grid axis)
    @pl.when(k == 0)
    def _():
        colsum_ref[...] = jnp.zeros_like(colsum_ref)

    colsum_ref[...] += jnp.sum(codes, axis=0, keepdims=True)


def fsptq_prepare_weight(weight, wt_scale, qcfg, *, TN=256, TK=512) -> PreparedWeight:
    """Fake-quantize the weight once: emit transposed bf16 codes + per-channel code sums."""
    _check_bits(qcfg)
    N, K = weight.shape
    wt_min, wt_max = get_qrange(qcfg["weight"]["args"]["signed"],
                                qcfg["weight"]["args"]["n_bits"])

    TNq, Np = _pick_tile(N, TN, 128)
    TKq, Kp = _pick_tile(K, TK, 128)

    ws = wt_scale.astype(jnp.float32).reshape(N)
    inv_ws = jnp.where(ws != 0, 1.0 / ws, 0.0)          # reciprocal once, zero-guarded

    # one-time layout plumbing (model-load time, not the hot path): [N,K] -> [K,N], pad
    wT = weight.astype(jnp.float32).T
    wT = jnp.pad(wT, ((0, Kp - K), (0, Np - N)))
    inv_ws_row = jnp.pad(inv_ws.reshape(1, N), ((0, 0), (0, Np - N)))
    ws_row = jnp.pad(ws.reshape(1, N), ((0, 0), (0, Np - N)))

    qwT, colsum = pl.pallas_call(
        functools.partial(_wquant_kernel, wt_min=float(wt_min), wt_max=float(wt_max)),
        out_shape=(jax.ShapeDtypeStruct((Kp, Np), jnp.bfloat16),
                   jax.ShapeDtypeStruct((1, Np), jnp.float32)),
        grid=(Np // TNq, Kp // TKq),                      # reduction (k) innermost
        in_specs=[
            pl.BlockSpec((TKq, TNq), lambda j, k: (k, j)),    # wT block
            pl.BlockSpec((1, TNq), lambda j, k: (0, j)),      # 1/wt_scale row
        ],
        out_specs=(
            pl.BlockSpec((TKq, TNq), lambda j, k: (k, j)),    # bf16 codes
            pl.BlockSpec((1, TNq), lambda j, k: (0, j)),      # colsum (resident over k)
        ),
        compiler_params=pltpu.CompilerParams(
            dimension_semantics=("parallel", "arbitrary")),
    )(wT, inv_ws_row)

    return PreparedWeight(qwT=qwT, ws_row=ws_row, colsum=colsum,
                          out_features=N, in_features=K)


# ----------------------------------------------------------------------------
# hot-path matmul kernel: quantize input codes, bf16-code MXU matmul,
# fold scales + zero-point correction into the epilogue
# ----------------------------------------------------------------------------
def _fsptq_matmul_kernel(in_q_ref,   # SMEM (3,) f32: [s_in, 1/s_in, z_in]
                         x_ref,      # VMEM (TM, TK) f32 input tile
                         qwT_ref,    # VMEM (TK, TN) bf16 weight codes (pre-transposed)
                         ws_ref,     # VMEM (1, TN)  f32 per-channel weight scale
                         csum_ref,   # VMEM (1, TN)  f32 per-channel code column sum
                         o_ref,      # VMEM (TM, TN) output tile
                         acc_ref,    # VMEM (TM, TN) f32 scratch accumulator
                         *, in_min, in_max):
    k = pl.program_id(2)

    @pl.when(k == 0)
    def _():
        acc_ref[...] = jnp.zeros_like(acc_ref)

    inv_s_in = in_q_ref[1]
    z_in = in_q_ref[2]

    # input codes: clamp(round(x * (1/s_in)) + z_in, qmin, qmax)
    cx = jnp.clip(jnp.round(x_ref[...] * inv_s_in) + z_in, in_min, in_max)

    # codes are exact in bf16 for n_bits <= 8 (and integer zero-points)
    # -> full-rate bf16 MXU matmul on v5e/v6e/v7x, f32 accumulation.
    acc_ref[...] += jnp.dot(cx.astype(jnp.bfloat16), qwT_ref[...],
                            preferred_element_type=jnp.float32)

    @pl.when(k == pl.num_programs(2) - 1)
    def _():
        s_in = in_q_ref[0]
        # out = s_in * s_w_j * ( sum_k cx*cw  -  z_in * sum_k cw )
        o_ref[...] = ((acc_ref[...] - z_in * csum_ref[...]) *
                      (s_in * ws_ref[...])).astype(o_ref.dtype)


def fsptq_linear_forward(x, qw: PreparedWeight, in_scale, in_offset, qcfg,
                         *, TM=256, TN=256, TK=512):
    """Fake-quantized linear forward on a prepared (pre-quantized) weight.

    x: [M, K] float.  Returns [M, out_features] in x.dtype.
    """
    _check_bits(qcfg)
    M, K = x.shape
    assert K == qw.in_features, "in_features mismatch"
    Kp, Np = qw.qwT.shape

    in_min, in_max = get_qrange(qcfg["input"]["args"]["signed"],
                                qcfg["input"]["args"]["n_bits"])

    TM_, Mp = _pick_tile(M, TM, 8)
    TN_, _ = _pick_tile(Np, TN, 128)
    TK_, _ = _pick_tile(Kp, TK, 128)

    xp = x.astype(jnp.float32)
    if (Mp, Kp) != (M, K):
        # zero padding is exact: padded weight codes are 0, so padded K columns
        # contribute nothing to either the dot or the colsum correction.
        xp = jnp.pad(xp, ((0, Mp - M), (0, Kp - K)))

    s_in = jnp.asarray(in_scale, jnp.float32).reshape(())
    z_in = jnp.asarray(in_offset, jnp.float32).reshape(())
    inv_s_in = jnp.where(s_in != 0, 1.0 / s_in, 0.0)     # zero-guarded reciprocal
    in_q = jnp.stack([s_in, inv_s_in, z_in])             # (3,) -> SMEM

    grid = (Mp // TM_, Np // TN_, Kp // TK_)              # reduction (k) innermost

    out = pl.pallas_call(
        functools.partial(_fsptq_matmul_kernel,
                          in_min=float(in_min), in_max=float(in_max)),
        out_shape=jax.ShapeDtypeStruct((Mp, Np), x.dtype),
        grid=grid,
        in_specs=[
            pl.BlockSpec(memory_space=pltpu.MemorySpace.SMEM),     # [s_in, 1/s_in, z_in]
            pl.BlockSpec((TM_, TK_), lambda i, j, k: (i, k)),       # x tile
            pl.BlockSpec((TK_, TN_), lambda i, j, k: (k, j)),       # bf16 weight codes
            pl.BlockSpec((1, TN_), lambda i, j, k: (0, j)),         # weight scale row
            pl.BlockSpec((1, TN_), lambda i, j, k: (0, j)),         # code column sums
        ],
        out_specs=pl.BlockSpec((TM_, TN_), lambda i, j, k: (i, j)),
        scratch_shapes=[pltpu.VMEM((TM_, TN_), jnp.float32)],
        compiler_params=pltpu.CompilerParams(
            dimension_semantics=("parallel", "parallel", "arbitrary")),
    )(in_q, xp, qw.qwT, qw.ws_row, qw.colsum)

    return out[:M, :qw.out_features]


# ----------------------------------------------------------------------------
# pure-JAX reference mirroring FSPTQBase.forward (Linear, round_pass branch)
# ----------------------------------------------------------------------------
def _reference(x, weight, in_scale, in_offset, wt_scale, qcfg):
    in_min, in_max = get_qrange(qcfg["input"]["args"]["signed"],
                                qcfg["input"]["args"]["n_bits"])
    wt_min, wt_max = get_qrange(qcfg["weight"]["args"]["signed"],
                                qcfg["weight"]["args"]["n_bits"])
    # Uses the same reciprocal-multiplies as the kernel glue so the quantization
    # codes are bit-identical (x/s vs x*(1/s) differ by <= 1 ulp, which could
    # otherwise flip a rare exact round-half case and spuriously fail the test).
    inv_s_in = jnp.where(in_scale != 0, 1.0 / in_scale, 0.0)
    inv_ws = jnp.where(wt_scale != 0, 1.0 / wt_scale, 0.0)
    q_x = jnp.clip(jnp.round(x * inv_s_in) + in_offset, in_min, in_max)
    q_x = (q_x - in_offset) * in_scale
    q_w = jnp.clip(jnp.round(weight * inv_ws), wt_min, wt_max) * wt_scale
    return jnp.dot(q_x, q_w.T, precision=lax.Precision.HIGHEST)


# ----------------------------------------------------------------------------
# demo / self-test
# ----------------------------------------------------------------------------
if __name__ == "__main__":
    # qconfig equivalent to the PyTorch module's common config
    # (signed 8-bit, per-tensor input, per-channel weight, round_pass branch)
    qconfig = {
        "input":  {"enable": True, "type": "tensor",
                   "args": {"signed": True, "n_bits": 8}},
        "weight": {"enable": True, "type": "channel_wise", "recon_type": "minmax",
                   "args": {"signed": True, "n_bits": 8}},
    }

    # Small, deliberately unaligned shapes (batch, in_features, out_features)
    # to exercise the padding / tile-shrinking path.
    M, K, N = 5, 200, 300

    key = jax.random.PRNGKey(0)
    kx, kw = jax.random.split(key)
    x = jax.random.normal(kx, (M, K), dtype=jnp.float32)
    weight = jax.random.normal(kw, (N, K), dtype=jnp.float32) * 0.05

    # Deterministic emulation of get_qparams_tensor (first-forward init state):
    #   input : per-tensor symmetric scale, zero offset
    #   weight: per-out-channel symmetric scale (+1e-6 as in the module)
    in_scale = jnp.max(jnp.abs(x)) / 127.0
    in_offset = jnp.zeros((1,), dtype=jnp.float32)
    wt_scale = jnp.max(jnp.abs(weight), axis=1, keepdims=True) / 127.0 + 1e-6  # (N, 1)

    # One-shot weight quantization pre-pass (model-load time), then the hot matmul.
    # Small TN/TK here just so the tiny test exercises a multi-block grid and the
    # k-accumulation path; production shapes should use the large defaults.
    qw = fsptq_prepare_weight(weight, wt_scale, qconfig, TN=128, TK=128)
    out = fsptq_linear_forward(x, qw, in_scale, in_offset, qconfig,
                               TM=256, TN=128, TK=128)
    out = jax.block_until_ready(out)

    ref = _reference(x, weight, in_scale, in_offset, wt_scale, qconfig)
    assert out.shape == (M, N)
    assert jnp.allclose(out, ref, atol=1e-3, rtol=1e-3), "mismatch vs reference"

    print("KERNEL_OK")
</pallas_src>

<mosaic_0001>
module attributes {stable_mosaic.version = 11 : i64} {
  func.func @_wquant_kernel(%arg0: i32, %arg1: i32, %arg2: memref<128x128xf32, #tpu.memory_space<vmem>>, %arg3: memref<1x128xf32, #tpu.memory_space<vmem>>, %arg4: memref<128x128xbf16, #tpu.memory_space<vmem>>, %arg5: memref<1x128xf32, #tpu.memory_space<vmem>>) attributes {dimension_semantics = [#tpu.dimension_semantics<parallel>, #tpu.dimension_semantics<arbitrary>], iteration_bounds = array<i64: 3, 2>, scalar_prefetch = 0 : i64, scratch_operands = 0 : i64, tpu.core_type = #tpu.core_type<tc>, window_params = [{transform_indices = @transform_0, window_bounds = array<i64: 128, 128>}, {transform_indices = @transform_1, window_bounds = array<i64: 1, 128>}, {transform_indices = @transform_2, window_bounds = array<i64: 128, 128>}, {transform_indices = @transform_3, window_bounds = array<i64: 1, 128>}]} {
    %c0 = arith.constant 0 : index
    %c0_0 = arith.constant 0 : index
    %0 = vector.load %arg2[%c0, %c0_0] : memref<128x128xf32, #tpu.memory_space<vmem>>, vector<128x128xf32>
    %c0_1 = arith.constant 0 : index
    %c0_2 = arith.constant 0 : index
    %1 = vector.load %arg3[%c0_1, %c0_2] : memref<1x128xf32, #tpu.memory_space<vmem>>, vector<1x128xf32>
    %2 = vector.broadcast %1 : vector<1x128xf32> to vector<128x128xf32>
    %3 = arith.mulf %0, %2 : vector<128x128xf32>
    %4 = math.roundeven %3 : vector<128x128xf32>
    %cst = arith.constant -1.280000e+02 : f32
    %cst_3 = arith.constant 1.270000e+02 : f32
    %5 = vector.broadcast %cst : f32 to vector<128x128xf32>
    %6 = arith.maximumf %5, %4 : vector<128x128xf32>
    %7 = vector.broadcast %cst_3 : f32 to vector<128x128xf32>
    %8 = arith.minimumf %7, %6 : vector<128x128xf32>
    %9 = arith.truncf %8 : vector<128x128xf32> to vector<128x128xbf16>
    %c0_4 = arith.constant 0 : index
    %c0_5 = arith.constant 0 : index
    %10 = vector.load %arg4[%c0_4, %c0_5] : memref<128x128xbf16, #tpu.memory_space<vmem>>, vector<128x128xbf16>
    tpu.vector_store %arg4[%c0_4, %c0_5], %9 {strides = array<i32>} : memref<128x128xbf16, #tpu.memory_space<vmem>>, vector<128x128xbf16>,
    %c0_i32 = arith.constant 0 : i32
    %11 = arith.cmpi eq, %arg1, %c0_i32 : i32
    %12 = arith.extui %11 : i1 to i32
    %c0_i32_6 = arith.constant 0 : i32
    %13 = arith.cmpi ne, %12, %c0_i32_6 : i32
    scf.if %13 {
      %cst_12 = arith.constant 0.000000e+00 : f32
      %19 = vector.broadcast %cst_12 : f32 to vector<1x128xf32>
      %c0_13 = arith.constant 0 : index
      %c0_14 = arith.constant 0 : index
      %20 = vector.load %arg5[%c0_13, %c0_14] : memref<1x128xf32, #tpu.memory_space<vmem>>, vector<1x128xf32>
      tpu.vector_store %arg5[%c0_13, %c0_14], %19 {strides = array<i32>} : memref<1x128xf32, #tpu.memory_space<vmem>>, vector<1x128xf32>,
    } else {
    }
    %c0_7 = arith.constant 0 : index
    %c0_8 = arith.constant 0 : index
    %14 = vector.load %arg5[%c0_7, %c0_8] : memref<1x128xf32, #tpu.memory_space<vmem>>, vector<1x128xf32>
    %cst_9 = arith.constant dense<0.000000e+00> : vector<128xf32>
    %15 = vector.multi_reduction <add>, %8, %cst_9 [0] : vector<128x128xf32> to vector<128xf32>
    %16 = vector.shape_cast %15 : vector<128xf32> to vector<1x128xf32>
    %17 = arith.addf %14, %16 : vector<1x128xf32>
    %c0_10 = arith.constant 0 : index
    %c0_11 = arith.constant 0 : index
    %18 = vector.load %arg5[%c0_10, %c0_11] : memref<1x128xf32, #tpu.memory_space<vmem>>, vector<1x128xf32>
    tpu.vector_store %arg5[%c0_10, %c0_11], %17 {strides = array<i32>} : memref<1x128xf32, #tpu.memory_space<vmem>>, vector<1x128xf32>,
    return
  }
  func.func @transform_0(%arg0: i32, %arg1: i32) -> (i32, i32) {
    %c0_i32 = arith.constant 0 : i32
    return %arg1, %arg0 : i32, i32
  }
  func.func @transform_1(%arg0: i32, %arg1: i32) -> (i32, i32) {
    %c0_i32 = arith.constant 0 : i32
    %c0_i32_0 = arith.constant 0 : i32
    return %c0_i32, %arg0 : i32, i32
  }
  func.func @transform_2(%arg0: i32, %arg1: i32) -> (i32, i32) {
    %c0_i32 = arith.constant 0 : i32
    return %arg1, %arg0 : i32, i32
  }
  func.func @transform_3(%arg0: i32, %arg1: i32) -> (i32, i32) {
    %c0_i32 = arith.constant 0 : i32
    %c0_i32_0 = arith.constant 0 : i32
    return %c0_i32, %arg0 : i32, i32
  }
}

</mosaic_0001>

<bundles_post_ra>
// kernel: tpu_custom_call.1
= control target key start
LH: loop header
LB: loop body
LE: loop exit
PB: predicated region body
PF: predicated region fallthrough
CT: control target
= control target key end

     0   :  { %9 = vsyncpa [#allocation3], 0  ;;  %s1484_s0 = inlined_call_operand.hbm [shape: f32[256,384], index: 0, kind: input, shape index: {}]   ;;  %s1485_s1 = inlined_call_operand.vmem [shape: f32[1,384], index: 1, kind: input, shape index: {}]   ;;  %s1486_s2 = inlined_call_operand.hbm [shape: bf16[256,384], index: 2, kind: output, shape index: {0}]   ;;  %s1487_s3 = inlined_call_operand.hbm [shape: f32[1,384], index: 3, kind: output, shape index: {1}]  }
   0x1   :  { %11 = vsyncpa [#allocation3 + $0x1], 0 }
   0x2   :  { %12 = vsyncpa [#allocation4], 0 }
   0x3   :  { %14 = vsyncpa [#allocation4 + $0x1], 0 }
   0x4   :  { %15 = vsyncpa [#allocation7], 0 }
   0x5   :  { %17 = vsyncpa [#allocation7 + $0x1], 0  ;;  %s1034_s12 = smov 0   ;;  %s1036_s13 = smov 0  }
   0x6   :  { %s1038_s14 = smov 0   ;;  %s1040_s15 = smov 0  }
   0x7   :  { %s1042_s16 = smov 0   ;;  %s1044_s17 = smov 0  }
   0x8   :  { %s1046_s18 = smov 0   ;;  %s1048_s19 = smov 0  }
   0x9   :  { %s1050_s20 = smov 0   ;;  %s1052_s21 = smov 0  }
   0xa   :  { %s1054_s22 = smov 0  }
   0xb LB: > { %1494 = sst [smem:[#allocation11_spill]] %s970_s14  ;;  %s587_s23 = sadd.s32 4294967295, %s1002_s22   ;;  %s1002_s22 = sphi %s1054_s22, %s23_s22   ;;  %s998_s21 = sphi %s1052_s21, %s1525_s21   ;;  %s994_s20 = sphi %s1050_s20, %s1524_s20   ;;  %s990_s19 = sphi %s1048_s19, %s1523_s19   ;;  %s986_s18 = sphi %s1046_s18, %s1522_s18   ;;  %s982_s17 = sphi %s1044_s17, %s1521_s17   ;;  %s978_s16 = sphi %s1042_s16, %s1520_s16   ;;  %s974_s15 = sphi %s1040_s15, %s1519_s15   ;;  %s970_s14 = sphi %s1038_s14, %s1513_s14   ;;  %s966_s13 = sphi %s1036_s13, %s1518_s13   ;;  %s962_s12 = sphi %s1034_s12, %s1517_s12  }
   0xc   : > { %s588_s24 = sadd.s32 4294967294, %s1002_s22   ;;  %s32_s25 = sadd.s32 1, %s994_s20 }
   0xd   : > { %s35_s26 = sadd.s32 1, %s998_s21  ;;  %p33_p0 = scmp.ge.s32.totalorder %s32_s25, 2 }
   0xe   : > { %s44_s27 = sadd.s32 1, %s982_s17  ;;  %p51_p1 = scmp.ne.s32.totalorder %s982_s17, %s978_s16 }
   0xf   : > { %p52_p2 = scmp.eq.s32.totalorder %s1002_s22, 0  ;;  %s1527_s25 = smov (%p33_p0, %s32_s25), 0 }
  0x10   : > { %1495 = sst [smem:[#allocation12_spill]] %s1527_s25  ;;  %s1529_s26 = smov (!%p33_p0, %s35_s26), %s998_s21 }
  0x11   : > { %s39_s28 = ssub.s32 %s994_s20, %s1527_s25  ;;  %p1102_p3 = por %p52_p2, %p51_p1 }
  0x12   : > { %p37_p4 = scmp.ge.s32.totalorder %s1529_s26, 3  ;;  %p57_p5 = scmp.ne.s32.totalorder %s978_s16, %s974_s15 }
  0x13   : > { %p58_p6 = scmp.eq.s32.totalorder %s587_s23, 0  ;;  %p1108_p7 = scmp.eq.s32.totalorder %s587_s23, 5 }
  0x14   : > { %s1531_s26 = smov (%p37_p4, %s1529_s26), 0  ;;  %p115_p10 = scmp.eq.s32.totalorder %s588_s24, 5 }
  0x15   : > { %1498 = sst [smem:[#allocation13_spill]] %s1531_s26  ;;  %p1114_p8 = por %p58_p6, %p57_p5 }
  0x16   : > { %p1120_p9 = por %p1108_p7, %p51_p1  ;;  %s40_s6 = ssub.s32 %s998_s21, %s1531_s26 }
  0x17   : > { %s41_s7 = sor.u32 %s40_s6, %s39_s28  ;;  %p122_p11 = scmp.eq.s32.totalorder %s40_s6, 0 }
  0x18   : > { %s1500_s5 = scalar_select %p1120_p9, 1, 0 }
  0x19   : > { %p42_p12 = scmp.eq.s32.totalorder %s41_s7, 0  ;;  %p1126_p13 = por %p115_p10, %p57_p5 }
  0x1a   : > { %s124_s9 = sadd.s32 1, %s970_s14  ;;  %p134_p0 = scmp.ne.s32.totalorder %s970_s14, %s966_s13 }
  0x1b   : > { %s1501_s8 = scalar_select %p1126_p13, 1, 0 }
  0x1c   : > { %s1134_s10 = scalar_select %p42_p12, %s982_s17, %s44_s27  }
  0x1d   : > { %s1137_s11 = scalar_select %p122_p11, %s970_s14, %s124_s9  }
  0x1e   : > { %1502 = sst [smem:[#allocation14_spill]] %s1134_s10  ;;  %p1141_p1 = por %p134_p0, %p1108_p7 }
  0x1f   : > { %1503 = sst [smem:[#allocation15_spill]] %s1137_s11  ;;  %p140_p2 = scmp.ne.s32.totalorder %s966_s13, %s962_s12 }
  0x20   : > { %s1504_s23 = scalar_select %p1141_p1, 1, 0 }
  0x21   : > { %p721_p4 = scmp.lt.s32.totalorder %s1002_s22, 6  ;;  %p1148_p6 = por %p140_p2, %p115_p10 }
  0x22   : > { %s161_s28 = sand.u32 1, %s982_s17   ;;  %s686_s7 = smul.u32 48, %s994_s20 }
  0x23   : > { %s1505_s24 = scalar_select %p1148_p6, 1, 0 }
  0x24   : > { %s591_s6 = sshll.u32 %s161_s28, 7  ;;  %p1156_p5 = pnand %p721_p4, %p1102_p3 }
  0x25   : > { %s165_s26 = scalar_lea.vmem [#allocation2], %s591_s6  ;;  %s171_s30 = sadd.s32 %s998_s21, %s686_s7 }
  0x26   : > { %s174_s25 = sshll.u32 %s165_s26, 4  ;;  %s594_s9 = sshll.u32 %s171_s30, 7  ;;  %s1161_s25 = int_to_ptr.vmem [resolvable:$true] %s174_s25 }
  0x27   : > { %s1166_s14 = scalar_lea.hbm %s1484_s0, %s594_s9  ;;  %s1168_s26 = scalar_lea.sflag [#allocation3], %s161_s28 }
  0x28   : > { %s818_s29 = scalar_lea.hbm %s1166_s14, 2048  ;;  %p820_p7 = pneg %p1156_p5 }
  0x29   : > { %p819_p3 = scmp.ne.s32.totalorder %s1166_s14, %s818_s29  ;;  %s823_s10 = scalar_lea.hbm %s1484_s0, 12288 }
  0x2a   : > { %p824_p12 = scmp.lt.u32.totalorder %s1166_s14, %s1484_s0  ;;  %p825_p0 = scmp.lt.u32.totalorder %s823_s10, %s818_s29 }
  0x2b   : > { %p821_p10 = pnand %p820_p7, %p819_p3  ;;  %p827_p4 = scmp.lt.u32.totalorder %s818_s29, %s1166_s14 }
  0x2c   : > { %p826_p2 = por %p825_p0, %p824_p12 }
  0x2d   : > { %p822_p11 = pneg %p821_p10 }
  0x2e   : > { %p828_p6 = por %p827_p4, %p826_p2 }
  0x30   : > { %p829_p13 = pnand %p828_p6, %p822_p11 }
  0x32   : > { %832 = shalt.err (!%p829_p13)
}
  0x33   : > { %s833_s28 = scalar_lea.vmem %s1161_s25, 2048  ;;  %s1004_s9 = smov [#allocation2]  }
  0x34   : > { %p834_p3 = scmp.ne.s32.totalorder %s1161_s25, %s833_s28  ;;  %s838_s6 = sshll.u32 %s1004_s9, 4  ;;  %s839_s6 = int_to_ptr.vmem [resolvable:$false] %s838_s6 }
  0x35   : > { %s840_s7 = scalar_lea.vmem %s839_s6, 4096  ;;  %p841_p9 = scmp.lt.s32.totalorder %s1161_s25, %s839_s6 }
  0x36   : > { %p836_p10 = pnand %p834_p3, %p820_p7  ;;  %p842_p12 = scmp.lt.s32.totalorder %s840_s7, %s833_s28 }
  0x38   : > { %p837_p1 = pneg %p836_p10  ;;  %p843_p0 = por %p842_p12, %p841_p9 }
  0x3a   : > { %p844_p2 = pnand %p843_p0, %p837_p1 }
  0x3c   : > { %847 = shalt.err (!%p844_p2)
}
  0x3d   : > { %s1005_s29 = smov 384   ;;  %s1006_s10 = smov 128  }
  0x3e   : > { %s1007_s11 = smov 8   ;;  %p595_p13 = scmp.ge.s32.totalorder %s1002_s22, 1 }
  0x3f   : > { %713 = dma.hbm_to_vmem [thread:$0]  (!%p1156_p5), %s1166_s14, 2048, %s1161_s25, %s1168_s26, %s1005_s29, %s1006_s10, %s1007_s11  }
  0x40   : > { %p188_p6 = scmp.lt.s32.totalorder %s1002_s22, 7 }
  0x42   : > { %p189_p7 = pnand %p595_p13, %p188_p6 }
  0x43   : > { %s1199_s30 = sand.u32 (!%p189_p7), 1, %s978_s16  }
  0x44   : > { %192 = sbr.rel (%p189_p7) target bundleno = 182 (0xb6), region = 28  ;;  %s596_s28 = sshll.u32 (!%p189_p7), %s1199_s30, 7 }
  0x45   : > { %s195_s9 = scalar_lea.sflag (!%p189_p7), [#allocation3], %s1199_s30  ;;  %s1203_s6 = scalar_lea.vmem (!%p189_p7), [#allocation2], %s596_s28 }
  0x4b   : > { %949 = dma.done.wait (%p1114_p8), %s195_s9, 2048  }
  0x4c   : > { %951 = vsyncadd (%p1114_p8), %s195_s9, 4294965248  ;;  %s1493_s14 = sand.u32 1, %s966_s13   ;;  %p229_p9 = scmp.lt.s32.totalorder %s990_s19, 2  ;;  %v233_v0 = vld [vmem:[%s1203_s6] sm:$0xff]  ;;  %v234_v1 = vld [vmem:[%s1203_s6 + $0x8] sm:$0xff] }
  0x4d   : > { %v235_v5 = vld [vmem:[%s1203_s6 + $0x10] sm:$0xff]  ;;  %v236_v6 = vld [vmem:[%s1203_s6 + $0x18] sm:$0xff]  ;;  %v237_v7 = vld [vmem:[%s1203_s6 + $0x20] sm:$0xff]  ;;  %s597_s7 = sshll.u32 %s1199_s30, 6  ;;  %s1342_s10 = scalar_lea.vmem [#allocation6], %s1493_s14 }
  0x4e   : > { %s230_s25 = scalar_select %p229_p9, %s990_s19, 2  ;;  %v238_v10 = vld [vmem:[%s1203_s6 + $0x28] sm:$0xff]  ;;  %v239_v12 = vld [vmem:[%s1203_s6 + $0x30] sm:$0xff]  ;;  %v240_v13 = vld [vmem:[%s1203_s6 + $0x38] sm:$0xff] }
  0x4f   : > { %v241_v30 = vld [vmem:[%s1203_s6 + $0x40] sm:$0xff]  ;;  %v242_v35 = vld [vmem:[%s1203_s6 + $0x48] sm:$0xff]  ;;  %v243_v36 = vld [vmem:[%s1203_s6 + $0x50] sm:$0xff]  ;;  %s1278_s29 = scalar_lea.vmem [#allocation5], %s597_s7  ;;  %p615_p8 = scmp.ne.s32.totalorder %s986_s18, 0 }
  0x50   : > { %s231_s4 = scalar_lea.vmem %s1485_s1, %s230_s25  ;;  %v244_v41 = vld [vmem:[%s1203_s6 + $0x58] sm:$0xff]  ;;  %v245_v42 = vld [vmem:[%s1203_s6 + $0x60] sm:$0xff]  ;;  %v246_v47 = vld [vmem:[%s1203_s6 + $0x68] sm:$0xff] }
  0x51   : > { %v1217_v2 = vld [vmem:[%s231_s4] ss:$0 sm:$0xff]  ;;  %v247_v52 = vld [vmem:[%s1203_s6 + $0x70] sm:$0xff]  ;;  %v248_v57 = vld [vmem:[%s1203_s6 + $0x78] sm:$0xff] }
  0x52   : > { %v256_v3 = vmul.f32 %v1217_v2, %v233_v0  ;;  %v257_v4 = vmul.f32 %v1217_v2, %v234_v1  ;;  %v258_v8 = vmul.f32 %v1217_v2, %v235_v5  ;;  %v259_v9 = vmul.f32 %v1217_v2, %v236_v6 }
  0x53   : > { %v260_v11 = vmul.f32 %v1217_v2, %v237_v7  ;;  %v261_v16 = vmul.f32 %v1217_v2, %v238_v10  ;;  %v262_v17 = vmul.f32 %v1217_v2, %v239_v12  ;;  %v263_v21 = vmul.f32 %v1217_v2, %v240_v13 }
  0x54   : > { %v687_v14 = vround.rtne.f32 %v256_v3  ;;  %v688_v15 = vround.rtne.f32 %v257_v4  ;;  %v689_v18 = vround.rtne.f32 %v258_v8  ;;  %v690_v19 = vround.rtne.f32 %v259_v9 }
  0x55   : > { %v691_v20 = vround.rtne.f32 %v260_v11  ;;  %v692_v24 = vround.rtne.f32 %v261_v16  ;;  %v693_v25 = vround.rtne.f32 %v262_v17  ;;  %v694_v29 = vround.rtne.f32 %v263_v21 }
  0x56   : > { %v1234_v22 = vmax.f32 %v687_v14, -128.0  ;;  %v1236_v23 = vmax.f32 %v688_v15, -128.0  ;;  %v1238_v26 = vmax.f32 %v689_v18, -128.0  ;;  %v1240_v27 = vmax.f32 %v690_v19, -128.0 }
  0x57   : > { %v1242_v28 = vmax.f32 %v691_v20, -128.0  ;;  %v1247_v33 = vmax.f32 %v692_v24, -128.0  ;;  %v1249_v34 = vmax.f32 %v693_v25, -128.0  ;;  %v1256_v40 = vmax.f32 %v694_v29, -128.0 }
  0x58   : > { %v304_v31 = vmin.f32 %v1234_v22, 127.0  ;;  %v305_v32 = vmin.f32 %v1236_v23, 127.0  ;;  %v306_v37 = vmin.f32 %v1238_v26, 127.0  ;;  %v307_v38 = vmin.f32 %v1240_v27, 127.0 }
  0x59   : > { %v308_v39 = vmin.f32 %v1242_v28, 127.0  ;;  %v309_v44 = vmin.f32 %v1247_v33, 127.0  ;;  %v310_v45 = vmin.f32 %v1249_v34, 127.0  ;;  %v264_v46 = vmul.f32 %v1217_v2, %v241_v30 }
  0x5a   : > { %v642_v43 = vpack.c.bf16 %v305_v32, %v304_v31  ;;  %v647_v48 = vpack.c.bf16 %v307_v38, %v306_v37  ;;  %v311_v49 = vmin.f32 %v1256_v40, 127.0  ;;  %v265_v50 = vmul.f32 %v1217_v2, %v242_v35 }
  0x5b   : > { %v266_v51 = vmul.f32 %v1217_v2, %v243_v36  ;;  %v652_v53 = vpack.c.bf16 %v309_v44, %v308_v39  ;;  %v695_v54 = vround.rtne.f32 %v264_v46  ;;  %v267_v55 = vmul.f32 %v1217_v2, %v244_v41 }
  0x5c   : > { %643 = vst [vmem:[%s1278_s29] sm:$0xff] %v642_v43   ;;  %v268_v56 = vmul.f32 %v1217_v2, %v245_v42  ;;  %679 = vst [vmem:[%s1278_s29 + $0x8] sm:$0xff] %v647_v48   ;;  %v657_v58 = vpack.c.bf16 %v311_v49, %v310_v45  ;;  %v696_v59 = vround.rtne.f32 %v265_v50  ;;  %v269_v61 = vmul.f32 %v1217_v2, %v246_v47 }
  0x5d   : > { %v697_v60 = vround.rtne.f32 %v266_v51  ;;  %680 = vst [vmem:[%s1278_s29 + $0x10] sm:$0xff] %v652_v53   ;;  %v1295_v62 = vmax.f32 %v695_v54, -128.0  ;;  %v698_v63 = vround.rtne.f32 %v267_v55  ;;  %v270_v1 = vmul.f32 %v1217_v2, %v247_v52 }
  0x5e   : > { %v699_v0 = vround.rtne.f32 %v268_v56  ;;  %681 = vst [vmem:[%s1278_s29 + $0x18] sm:$0xff] %v657_v58   ;;  %v1299_v3 = vmax.f32 %v696_v59, -128.0  ;;  %v700_v5 = vround.rtne.f32 %v269_v61  ;;  %v271_v6 = vmul.f32 %v1217_v2, %v248_v57 }
  0x5f   : > { %v1301_v4 = vmax.f32 %v697_v60, -128.0  ;;  %v312_v7 = vmin.f32 %v1295_v62, 127.0  ;;  %v1305_v8 = vmax.f32 %v698_v63, -128.0  ;;  %v701_v10 = vround.rtne.f32 %v270_v1 }
  0x60   : > { %v1307_v9 = vmax.f32 %v699_v0, -128.0  ;;  %v313_v11 = vmin.f32 %v1299_v3, 127.0  ;;  %v1311_v13 = vmax.f32 %v700_v5, -128.0  ;;  %v702_v14 = vround.rtne.f32 %v271_v6 }
  0x61   : > { %v314_v12 = vmin.f32 %v1301_v4, 127.0  ;;  %v315_v2 = vmin.f32 %v1305_v8, 127.0  ;;  %v1315_v16 = vmax.f32 %v701_v10, -128.0  ;;  %v1008_v30 = vmov (!%p615_p8), 0.0  }
  0x62   : > { %v316_v15 = vmin.f32 %v1307_v9, 127.0  ;;  %v662_v17 = vpack.c.bf16 %v313_v11, %v312_v7  ;;  %v317_v18 = vmin.f32 %v1311_v13, 127.0  ;;  %v1322_v19 = vmax.f32 %v702_v14, -128.0  ;;  %403 = sbr.rel (%p615_p8) target bundleno = 105 (0x69), region = 36  ;;  %404 = vst [vmem:[%s1342_s10] sm:$0x1] (!%p615_p8), %v1008_v30 }
  0x63   : > { %v667_v20 = vpack.c.bf16 %v315_v2, %v314_v12  ;;  %v318_v21 = vmin.f32 %v1315_v16, 127.0 }
  0x64   : > { %682 = vst [vmem:[%s1278_s29 + $0x20] sm:$0xff] %v662_v17   ;;  %v672_v24 = vpack.c.bf16 %v317_v18, %v316_v15  ;;  %v319_v25 = vmin.f32 %v1322_v19, 127.0 }
  0x65   : > { %683 = vst [vmem:[%s1278_s29 + $0x28] sm:$0xff] %v667_v20  }
  0x66   : > { %684 = vst [vmem:[%s1278_s29 + $0x30] sm:$0xff] %v672_v24   ;;  %v677_v29 = vpack.c.bf16 %v319_v25, %v318_v21 }
  0x68   : > { %685 = vst [vmem:[%s1278_s29 + $0x38] sm:$0xff] %v677_v29  }
  0x69 PF: > { %v406_v35 = vadd.f32 %v305_v32, %v304_v31  ;;  %s703_s11 = smul.u32 48, %s986_s18  ;;  %s449_s28 = sshll.u32 %s1278_s29, 4  ;;  %s1355_s28 = int_to_ptr.vmem [resolvable:$true] %s449_s28 }
  0x6a   : > { %s430_s18 = scalar_lea.sflag [#allocation4], %s1199_s30  ;;  %s848_s4 = scalar_lea.vmem %s1355_s28, 1024 }
  0x6b   : > { %v407_v36 = vadd.f32 %v406_v35, %v306_v37  ;;  %s446_s9 = sadd.s32 %s990_s19, %s703_s11  ;;  %p849_p1 = scmp.ne.s32.totalorder %s1355_s28, %s848_s4 }
  0x6c   : > { %s619_s6 = sshll.u32 %s446_s9, 6  ;;  %p1507_p5 = scmp.ne.s32.totalorder %s1500_s5, 0 }
  0x6d   : > { %v408_v22 = vadd.f32 %v407_v36, %v307_v38  ;;  %s1362_s26 = scalar_lea.hbm %s1486_s2, %s619_s6  ;;  %s1009_s7 = smov [#allocation5]  }
  0x6e   : > { %p850_p11 = pnand %p849_p1, %p1507_p5  ;;  %s852_s29 = sshll.u32 %s1009_s7, 4  ;;  %s853_s29 = int_to_ptr.vmem [resolvable:$false] %s852_s29 }
  0x6f   : > { %s854_s11 = scalar_lea.vmem %s853_s29, 2048  ;;  %p855_p3 = scmp.lt.s32.totalorder %s1355_s28, %s853_s29 }
  0x70   : > { %p851_p4 = pneg %p850_p11  ;;  %p856_p10 = scmp.lt.s32.totalorder %s854_s11, %s848_s4 }
  0x72   : > { %p857_p12 = por %p856_p10, %p855_p3 }
  0x74   : > { %p858_p0 = pnand %p857_p12, %p851_p4 }
  0x76   : > { %861 = shalt.err (!%p858_p0)
}
  0x77   : > { %s862_s9 = scalar_lea.hbm %s1362_s26, 1024  ;;  %s866_s27 = scalar_lea.hbm %s1486_s2, 6144 }
  0x78   : > { %p863_p2 = scmp.ne.s32.totalorder %s1362_s26, %s862_s9  ;;  %p867_p7 = scmp.lt.u32.totalorder %s1362_s26, %s1486_s2 }
  0x79   : > { %p868_p9 = scmp.lt.u32.totalorder %s866_s27, %s862_s9  ;;  %p870_p1 = scmp.lt.u32.totalorder %s862_s9, %s1362_s26 }
  0x7a   : > { %p864_p13 = pnand %p863_p2, %p1507_p5 }
  0x7b   : > { %p869_p8 = por %p868_p9, %p867_p7 }
  0x7c   : > { %p865_p6 = pneg %p864_p13 }
  0x7d   : > { %p871_p11 = por %p870_p1, %p869_p8 }
  0x7f   : > { %p872_p4 = pnand %p871_p11, %p865_p6 }
  0x81   : > { %875 = shalt.err (!%p872_p4)
}
  0x82   : > { %s1010_s4 = smov 64   ;;  %s1011_s11 = smov 192   ;;  %v409_v23 = vadd.f32 %v408_v22, %v308_v39  ;;  %v405_v46 = vld [vmem:[%s1342_s10] sm:$0x1] }
  0x83   : > { %s1012_s14 = smov 4   ;;  %s620_s5 = sshll.u32 %s990_s19, 4 }
  0x84   : > { %706 = dma.vmem_to_hbm [thread:$0]  (%p1507_p5), %s1355_s28, 1024, %s1362_s26, %s430_s18, %s1010_s4, %s1011_s11, %s1012_s14   ;;  %v410_v26 = vadd.f32 %v409_v23, %v309_v44 }
  0x85   : > { %s465_s30 = sshll.u32 %s1342_s10, 4  ;;  %s1416_s26 = scalar_lea.hbm %s1487_s3, %s620_s5  ;;  %s1418_s30 = int_to_ptr.vmem [resolvable:$true] %s465_s30 }
  0x86   : > { %v411_v27 = vadd.f32 %v410_v26, %v310_v45  ;;  %s1508_s18 = sand.u32 1, %s966_s13   ;;  %s876_s6 = scalar_lea.vmem %s1418_s30, 16 }
  0x87   : > { %s435_s9 = scalar_lea.sflag [#allocation7], %s1508_s18  ;;  %p877_p5 = scmp.ne.s32.totalorder %s1418_s30, %s876_s6 }
  0x88   : > { %v412_v31 = vadd.f32 %v411_v27, %v311_v49  ;;  %p1509_p3 = scmp.ne.s32.totalorder %s1504_s23, 0  ;;  %s1013_s19 = smov [#allocation6]  }
  0x89   : > { %s880_s25 = sshll.u32 %s1013_s19, 4  ;;  %s881_s25 = int_to_ptr.vmem [resolvable:$false] %s880_s25 }
  0x8a   : > { %v413_v32 = vadd.f32 %v412_v31, %v312_v7  ;;  %p878_p10 = pnand %p877_p5, %p1509_p3  ;;  %s882_s27 = scalar_lea.vmem %s881_s25, 32 }
  0x8b   : > { %p883_p0 = scmp.lt.s32.totalorder %s1418_s30, %s881_s25  ;;  %p884_p2 = scmp.lt.s32.totalorder %s882_s27, %s876_s6 }
  0x8c   : > { %v414_v37 = vadd.f32 %v413_v32, %v313_v11  ;;  %p879_p12 = pneg %p878_p10 }
  0x8d   : > { %p885_p13 = por %p884_p2, %p883_p0 }
  0x8e   : > { %v415_v28 = vadd.f32 %v414_v37, %v314_v12 }
  0x8f   : > { %p886_p6 = pnand %p885_p13, %p879_p12 }
  0x90   : > { %v416_v33 = vadd.f32 %v415_v28, %v315_v2 }
  0x92   : > { %v417_v34 = vadd.f32 %v416_v33, %v316_v15 }
  0x94   : > { %v418_v38 = vadd.f32 %v417_v34, %v317_v18 }
  0x96   : > { %v419_v39 = vadd.f32 %v418_v38, %v318_v21 }
  0x98   : > { %v420_v40 = vadd.f32 %v419_v39, %v319_v25 }
  0x9a   : > { %v421_v41 = vrot.slane %v420_v40, 4 }
  0x9c   : > { %v422_v42 = vadd.f32 %v421_v41, %v420_v40 }
  0x9e   : > { %v423_v43 = vrot.slane %v422_v42, 2 }
  0xa0   : > { %v424_v44 = vadd.f32 %v423_v43, %v422_v42 }
  0xa2   : > { %v425_v45 = vrot.slane %v424_v44, 1 }
  0xa4   : > { %v426_v47 = vadd.f32 %v425_v45, %v424_v44 }
  0xa6   : > { %v427_v48 = vadd.f32 %v426_v47, %v405_v46 }
  0xa8   : > { %428 = vst [vmem:[%s1342_s10] sm:$0x1] %v427_v48 }
  0xa9   : > { %889 = shalt.err (!%p886_p6)
}
  0xaa   : > { %s890_s10 = scalar_lea.hbm %s1416_s26, 16  ;;  %s894_s4 = scalar_lea.hbm %s1487_s3, 48 }
  0xab   : > { %p891_p7 = scmp.ne.s32.totalorder %s1416_s26, %s890_s10  ;;  %p895_p1 = scmp.lt.u32.totalorder %s1416_s26, %s1487_s3 }
  0xac   : > { %p896_p11 = scmp.lt.u32.totalorder %s894_s4, %s890_s10  ;;  %p898_p5 = scmp.lt.u32.totalorder %s890_s10, %s1416_s26 }
  0xad   : > { %p892_p9 = pnand %p891_p7, %p1509_p3 }
  0xae   : > { %p897_p4 = por %p896_p11, %p895_p1 }
  0xaf   : > { %p893_p8 = pneg %p892_p9 }
  0xb0   : > { %p899_p10 = por %p898_p5, %p897_p4 }
  0xb2   : > { %p900_p12 = pnand %p899_p10, %p893_p8 }
  0xb4   : > { %903 = shalt.err (!%p900_p12)
}
  0xb5   : > { %707 = dma.vmem_to_hbm [thread:$0]  (%p1509_p3), %s1418_s30, 16, %s1416_s26, %s435_s9  }
  0xb6 PF: > { %p722_p0 = scmp.ge.s32.totalorder %s1002_s22, 2  ;;  %s477_s14 = sand.u32 1, %s974_s15  }
  0xb7   : > { %p1510_p2 = scmp.ne.s32.totalorder %s1501_s8, 0  ;;  %s478_s28 = scalar_lea.sflag [#allocation4], %s477_s14 }
  0xb9   : > { %p715_p13 = pnand %p722_p0, %p1510_p2 }
  0xbb   : > { %953 = dma.done.wait (!%p715_p13), %s478_s28, 1024  }
  0xbc   : > { %955 = vsyncadd (!%p715_p13), %s478_s28, 4294966272  ;;  %s486_s18 = sand.u32 1, %s962_s12   ;;  %p1511_p6 = scmp.ne.s32.totalorder %s1505_s24, 0 }
  0xbd   : > { %s487_s23 = scalar_lea.sflag [#allocation7], %s486_s18 }
  0xbe   : > { %p718_p7 = pnand %p722_p0, %p1511_p6 }
  0xc0   : > { %957 = dma.done.wait (!%p718_p7), %s487_s23, 16  }
  0xc1   : > { %959 = vsyncadd (!%p718_p7), %s487_s23, 4294967280  ;;  %s23_s22 = sadd.s32 1, %s1002_s22   ;;  %s1512_s30 = sld [smem:[#allocation11_spill]] }
  0xc2   : > { %p20_p3 = scmp.ge.s32.totalorder %s23_s22, 8   ;;  %s1513_s14 = sld [smem:[#allocation15_spill]] }
  0xc3   : > { %s1514_s8 = sld [smem:[#allocation14_spill]]  ;;  %s1515_s26 = sld [smem:[#allocation12_spill]] }
  0xc4   : > { %s1516_s9 = sld [smem:[#allocation13_spill]]  ;;  %s1517_s12 = smov %s966_s13 }
  0xc5   : > { %s1519_s15 = smov %s978_s16  ;;  %s1520_s16 = smov %s982_s17 }
  0xc6   : > { %s1522_s18 = smov %s994_s20  ;;  %s1523_s19 = smov %s998_s21 }
  0xc7   : > { %s1518_s13 = smov %s1512_s30  ;;  %22 = sbr.rel (!%p20_p3) target bundleno = 11 (0xb), region = 97 }
  0xc9   : > { %s1521_s17 = smov %s1514_s8  ;;  %s1524_s20 = smov %s1515_s26 }
  0xca   : > { %s1525_s21 = smov %s1516_s9 }
  0xce   :  { %491 = vsyncpa [#allocation3], 1 }
  0xcf   :  { %493 = vsyncpa [#allocation3 + $0x1], 1 }
  0xd0   :  { %494 = vsyncpa [#allocation4], 1 }
  0xd1   :  { %496 = vsyncpa [#allocation4 + $0x1], 1 }
  0xd2   :  { %497 = vsyncpa [#allocation7], 1 }
  0xd3   :  { %499 = vsyncpa [#allocation7 + $0x1], 1 }

</bundles_post_ra>
